<compile_context>
chip_gen: v7x
topology: tpu7x:2x2x1
jax: 0.10.0
libtpu: 0.0.40
codegen_flags: <defaults>
</compile_context>

<pallas_src>
import jax
import jax.numpy as jnp
from jax.experimental import pallas as pl
from jax.experimental.pallas import tpu as pltpu


def _round_up(x, m):
    return (x + m - 1) // m * m


# ----------------------------------------------------------------------------
# Primary path: weight-resident streaming matmul over the batch axis.
# ----------------------------------------------------------------------------
def _k_net_stream_kernel(x_ref, w_ref, o_ref):
    # x_ref: (tm, K), w_ref: (K, N) -- whole weight, resident; o_ref: (tm, N)
    o_ref[...] = jnp.dot(
        x_ref[...], w_ref[...], preferred_element_type=jnp.float32
    ).astype(o_ref.dtype)


def _choose_tm(B, K, N, x_isz, o_isz, *, budget_bytes=16 << 20, cap=2048):
    """Largest M tile whose double-buffered x/out tiles fit the VMEM budget."""
    per_row = 2 * (K * x_isz + N * o_isz)
    tm = max(8, budget_bytes // max(per_row, 1))
    tm = min(cap, tm)
    tm = (tm // 8) * 8
    if B <= tm:
        return B  # block dim == full array dim -> single grid step, always legal
    return tm


def _k_net_forward_stream(data, weight_t, *, block_m=None):
    B, K = data.shape
    _, N = weight_t.shape
    out_dtype = data.dtype
    x_isz = data.dtype.itemsize
    w_isz = weight_t.dtype.itemsize
    o_isz = jnp.dtype(out_dtype).itemsize

    tm = block_m if block_m is not None else _choose_tm(B, K, N, x_isz, o_isz)
    grid = (pl.cdiv(B, tm),)

    # Double-buffered x/out tiles + (effectively single-DMA) resident weight.
    needed = 2 * tm * (K * x_isz + N * o_isz) + 2 * K * N * w_isz
    vmem_limit = int(min(48 << 20, max(16 << 20, int(needed * 1.5))))

    cost = pl.CostEstimate(
        flops=2 * B * K * N,
        transcendentals=0,
        bytes_accessed=B * K * x_isz + K * N * w_isz + B * N * o_isz,
    )

    return pl.pallas_call(
        _k_net_stream_kernel,
        out_shape=jax.ShapeDtypeStruct((B, N), out_dtype),
        grid_spec=pltpu.PrefetchScalarGridSpec(
            num_scalar_prefetch=0,
            grid=grid,
            in_specs=[
                pl.BlockSpec((tm, K), lambda i: (i, 0)),
                pl.BlockSpec((K, N), lambda i: (0, 0)),
            ],
            out_specs=pl.BlockSpec((tm, N), lambda i: (i, 0)),
        ),
        compiler_params=pltpu.CompilerParams(
            dimension_semantics=("parallel",),
            vmem_limit_bytes=vmem_limit,
        ),
        cost_estimate=cost,
    )(data, weight_t)


# ----------------------------------------------------------------------------
# Fallback path (only when the full weight is too big to keep resident):
# classic 3-D tiled matmul with f32 accumulator (P1 + P3).
# ----------------------------------------------------------------------------
def _k_net_tiled_kernel(x_ref, w_ref, o_ref, acc_ref):
    @pl.when(pl.program_id(2) == 0)
    def _():
        acc_ref[...] = jnp.zeros_like(acc_ref)

    acc_ref[...] += jnp.dot(
        x_ref[...], w_ref[...], preferred_element_type=jnp.float32
    )

    @pl.when(pl.program_id(2) == pl.num_programs(2) - 1)
    def _():
        o_ref[...] = acc_ref[...].astype(o_ref.dtype)


def _k_net_forward_tiled(data, weight_t, *, tm=256, tn=256, tk=256):
    B, K = data.shape
    _, N = weight_t.shape
    out_dtype = data.dtype
    isz = data.dtype.itemsize
    sublane = 8 if isz == 4 else 16

    tm = min(tm, _round_up(B, sublane))
    tn = min(tn, _round_up(N, 128))
    tk = min(tk, _round_up(K, 128))
    Mp, Np, Kp = _round_up(B, tm), _round_up(N, tn), _round_up(K, tk)

    x, w = data, weight_t
    if (Mp, Kp) != (B, K):
        x = jnp.pad(x, ((0, Mp - B), (0, Kp - K)))
    if (Kp, Np) != (K, N):
        w = jnp.pad(w, ((0, Kp - K), (0, Np - N)))

    out = pl.pallas_call(
        _k_net_tiled_kernel,
        out_shape=jax.ShapeDtypeStruct((Mp, Np), out_dtype),
        grid_spec=pltpu.PrefetchScalarGridSpec(
            num_scalar_prefetch=0,
            grid=(Mp // tm, Np // tn, Kp // tk),
            in_specs=[
                pl.BlockSpec((tm, tk), lambda i, j, k: (i, k)),
                pl.BlockSpec((tk, tn), lambda i, j, k: (k, j)),
            ],
            out_specs=pl.BlockSpec((tm, tn), lambda i, j, k: (i, j)),
            scratch_shapes=[pltpu.VMEM((tm, tn), jnp.float32)],
        ),
        compiler_params=pltpu.CompilerParams(
            dimension_semantics=("parallel", "parallel", "arbitrary"),
            vmem_limit_bytes=48 << 20,
        ),
    )(x, w)
    if (Mp, Np) != (B, N):
        out = out[:B, :N]
    return out


# ----------------------------------------------------------------------------
# Public forward
# ----------------------------------------------------------------------------
# Use the weight-resident streaming kernel whenever a single weight buffer
# stays under this many bytes (double-buffered it is 2x; well inside VMEM).
_WEIGHT_RESIDENT_BYTES = 8 << 20


def k_net_forward(data, weight_t, *, use_pallas=True, block_m=None):
    """Koopman forward: data @ weight_t.

    data:     (B, n_input)
    weight_t: (n_input, n_output) -- PyTorch weight transposed ONCE at init.
    """
    B, K = data.shape
    Kw, N = weight_t.shape
    assert K == Kw, "weight_t must have shape (n_input, n_output)"

    if not use_pallas:
        return jnp.dot(data, weight_t).astype(data.dtype)

    if K * N * weight_t.dtype.itemsize <= _WEIGHT_RESIDENT_BYTES:
        return _k_net_forward_stream(data, weight_t, block_m=block_m)
    return _k_net_forward_tiled(data, weight_t)


def make_orthogonal_weight_t(key, n_input, n_output, dtype=jnp.float32):
    """Orthogonal Koopman operator stored directly in (n_input, n_output) layout.

    Equals W.T for a PyTorch nn.Linear weight W of shape (n_output, n_input)
    sampled like geotorch's uniform orthogonal distribution.  The transpose is
    done exactly once here, at init -- never in the forward pass.
    """
    # TODO(synk): geotorch's exact 'uniform' sampler isn't reproduced bit-for-bit;
    # this is a QR-based Haar orthogonal sample with matching constraints.
    big, small = max(n_input, n_output), min(n_input, n_output)
    a = jax.random.normal(key, (big, small), dtype=jnp.float32)
    q, r = jnp.linalg.qr(a)
    d = jnp.diagonal(r)
    q = q * jnp.where(d >= 0, 1.0, -1.0)[None, :]   # robust sign fix (no zeroed cols)
    if n_output >= n_input:
        w = q[:n_output, :n_input]      # PyTorch layout (n_output, n_input)
    else:
        w = q[:n_input, :n_output].T    # PyTorch layout (n_output, n_input)
    return jnp.asarray(w.T, dtype=dtype)            # (n_input, n_output)


if __name__ == "__main__":
    key = jax.random.PRNGKey(0)
    k_w, k_x = jax.random.split(key)

    # Small shapes consistent with a Koopman operator acting on latent state vectors.
    batch, n_input, n_output = 64, 32, 32
    weight_t = make_orthogonal_weight_t(k_w, n_input, n_output)     # (n_input, n_output)
    data = jax.random.normal(k_x, (batch, n_input), dtype=jnp.float32)

    ref = data @ weight_t

    # 1) Weight-resident streaming Pallas kernel (single grid step).
    out = jax.block_until_ready(k_net_forward(data, weight_t))
    assert out.shape == (batch, n_output)
    assert jnp.allclose(out, ref, atol=1e-4, rtol=1e-4)

    # 2) Non-aligned shapes + forced multi-tile grid with a ragged last M tile
    #    (exercises Pallas boundary masking; no wrapper-side padding).
    k_w2, k_x2 = jax.random.split(jax.random.PRNGKey(1))
    b2, k2, n2 = 300, 96, 80
    w2 = make_orthogonal_weight_t(k_w2, k2, n2)
    x2 = jax.random.normal(k_x2, (b2, k2), dtype=jnp.float32)
    o2 = jax.block_until_ready(k_net_forward(x2, w2, block_m=128))
    assert o2.shape == (b2, n2)
    assert jnp.allclose(o2, x2 @ w2, atol=1e-4, rtol=1e-4)

    # 3) Plain-XLA reference path still available.
    o3 = jax.block_until_ready(k_net_forward(data, weight_t, use_pallas=False))
    assert jnp.allclose(o3, ref, atol=1e-4, rtol=1e-4)

    print("KERNEL_OK")
</pallas_src>

<mosaic_0001>
module attributes {stable_mosaic.version = 11 : i64} {
  func.func @_k_net_stream_kernel(%arg0: i32, %arg1: memref<64x32xf32, #tpu.memory_space<vmem>>, %arg2: memref<32x32xf32, #tpu.memory_space<vmem>>, %arg3: memref<64x32xf32, #tpu.memory_space<vmem>>) attributes {dimension_semantics = [#tpu.dimension_semantics<parallel>], iteration_bounds = array<i64: 1>, scalar_prefetch = 0 : i64, scratch_operands = 0 : i64, tpu.core_type = #tpu.core_type<tc>, window_params = [{transform_indices = @transform_0, window_bounds = array<i64: 64, 32>}, {pipeline_mode = #tpu.pipeline_mode<synchronous>, transform_indices = @transform_1, window_bounds = array<i64: 32, 32>}, {transform_indices = @transform_2, window_bounds = array<i64: 64, 32>}]} {
    %c0 = arith.constant 0 : index
    %c0_0 = arith.constant 0 : index
    %0 = vector.load %arg1[%c0, %c0_0] : memref<64x32xf32, #tpu.memory_space<vmem>>, vector<64x32xf32>
    %c0_1 = arith.constant 0 : index
    %c0_2 = arith.constant 0 : index
    %1 = vector.load %arg2[%c0_1, %c0_2] : memref<32x32xf32, #tpu.memory_space<vmem>>, vector<32x32xf32>
    %cst = arith.constant dense<0.000000e+00> : vector<64x32xf32>
    %2 = tpu.matmul %0, %1, %cst {dimension_numbers = #tpu.dot_dimension_numbers<[1], [0], [0], [1], [0, 0, 1, 1], [], []>} : vector<64x32xf32>, vector<32x32xf32>, vector<64x32xf32> -> vector<64x32xf32>
    %c0_3 = arith.constant 0 : index
    %c0_4 = arith.constant 0 : index
    %3 = vector.load %arg3[%c0_3, %c0_4] : memref<64x32xf32, #tpu.memory_space<vmem>>, vector<64x32xf32>
    tpu.vector_store %arg3[%c0_3, %c0_4], %2 {strides = array<i32>} : memref<64x32xf32, #tpu.memory_space<vmem>>, vector<64x32xf32>,
    return
  }
  func.func @transform_0(%arg0: i32) -> (i32, i32) {
    %c0_i32 = arith.constant 0 : i32
    %c0_i32_0 = arith.constant 0 : i32
    return %arg0, %c0_i32 : i32, i32
  }
  func.func @transform_1(%arg0: i32) -> (i32, i32) {
    %c0_i32 = arith.constant 0 : i32
    %c0_i32_0 = arith.constant 0 : i32
    %c0_i32_1 = arith.constant 0 : i32
    return %c0_i32, %c0_i32_0 : i32, i32
  }
  func.func @transform_2(%arg0: i32) -> (i32, i32) {
    %c0_i32 = arith.constant 0 : i32
    %c0_i32_0 = arith.constant 0 : i32
    return %arg0, %c0_i32 : i32, i32
  }
}

</mosaic_0001>

<bundles_post_ra>
// kernel: tpu_custom_call.1
= control target key start
LH: loop header
LB: loop body
LE: loop exit
PB: predicated region body
PF: predicated region fallthrough
CT: control target
= control target key end

     0   :  { %vm23_vm0 = vcmask 261120   ;;  %s308_s1 = inlined_call_operand.vmem [shape: f32[32,32], index: 1, kind: input, shape index: {}]   ;;  %s309_s0 = inlined_call_operand.vmem [shape: f32[64,32], index: 0, kind: input, shape index: {}]   ;;  %s310_s2 = inlined_call_operand.vmem [shape: f32[64,32], index: 2, kind: output, shape index: {}]  }
   0x1   :  { %v19_v0 = vld [vmem:[%s308_s1] sm:$0xff]  ;;  %v20_v1 = vld [vmem:[%s308_s1 + $0x8] sm:$0xff]  ;;  %v21_v2 = vld [vmem:[%s308_s1 + $0x10] sm:$0xff] }
   0x2   :  { %v205_v3 = vpack.c.bf16 %v20_v1, %v19_v0  ;;  %v22_v4 = vld [vmem:[%s308_s1 + $0x18] sm:$0xff]  ;;  %v11_v5 = vld [vmem:[%s309_s0] sm:$0xff]  ;;  %v12_v8 = vld [vmem:[%s309_s0 + $0x8] sm:$0xff] }
   0x3   :  { %v15_v6 = vld [vmem:[%s309_s0 + $0x20] sm:$0xff]  ;;  %v209_v7 = vpack.c.bf16 %v22_v4, %v21_v2  ;;  %193 = vmatprep.mubr.msk.f32.mxu0 %vm23_vm0, %v11_v5  ;;  %v16_v9 = vld [vmem:[%s309_s0 + $0x28] sm:$0xff]  ;;  %v13_v10 = vld [vmem:[%s309_s0 + $0x10] sm:$0xff] }
   0x4   :  { %199 = vmatprep.mubr.msk.f32.mxu1 %vm23_vm0, %v15_v6  ;;  %206 = vmatprep.subr.bf16.mxu0 %v205_v3  ;;  %v17_v11 = vld [vmem:[%s309_s0 + $0x30] sm:$0xff]  ;;  %v14_v12 = vld [vmem:[%s309_s0 + $0x18] sm:$0xff] }
   0x5   :  { %213 = vmatprep.subr.bf16.mxu1 %v205_v3  ;;  %208 = vmatpush3.bf16.msra.mxu0 %v205_v3  ;;  %v18_v13 = vld [vmem:[%s309_s0 + $0x38] sm:$0xff] }
   0x6   :  { %215 = vmatpush3.bf16.msra.mxu1 %v205_v3  ;;  %210 = vmatprep.subr.bf16.mxu0 %v209_v7 }
   0x7   :  { %214 = vmatprep.subr.bf16.mxu1 %v209_v7 }
   0x9   :  { %212 = vmatpush3.bf16.msra.mxu0 %v209_v7 }
   0xa   :  { %216 = vmatpush3.bf16.msra.mxu1 %v209_v7 }
   0xc   :  { %194 = vmatmul.mubr.msk.f32.vlgmr.msra.gmra.mrb[0].mxu0 %vm23_vm0, %v12_v8 }
   0xd   :  { %200 = vmatmul.mubr.msk.f32.vlgmr.msra.gmra.mrb[0].mxu1 %vm23_vm0, %v16_v9  ;;  %196 = vmatprep.mubr.msk.f32.mxu0 %vm23_vm0, %v13_v10 }
   0xe   :  { %202 = vmatprep.mubr.msk.f32.mxu1 %vm23_vm0, %v17_v11 }
  0x10   :  { %197 = vmatmul.mubr.msk.f32.gmra.mrb[2].mxu0 %vm23_vm0, %v14_v12 }
  0x11   :  { %203 = vmatmul.mubr.msk.f32.gmra.mrb[2].mxu1 %vm23_vm0, %v18_v13 }
  0xdf   :  { %v195_v14 = vpop.f32.mrb[0].mxu0 }
  0xe0   :  { %v201_v15 = vpop.f32.mrb[0].mxu1  ;;  %154 = vst.msk [vmem:[%s310_s2 + $0x8] sm:$0xff] %vm23_vm0, %v195_v14  ;;  %v114_v16 = vpop.f32.mrb[1].mxu0 }
  0xe1   :  { %158 = vst.msk [vmem:[%s310_s2 + $0x28] sm:$0xff] %vm23_vm0, %v201_v15  ;;  %v134_v17 = vpop.f32.mrb[1].mxu1  ;;  %153 = vst.msk [vmem:[%s310_s2] sm:$0xff] %vm23_vm0, %v114_v16 }
  0xe2   :  { %157 = vst.msk [vmem:[%s310_s2 + $0x20] sm:$0xff] %vm23_vm0, %v134_v17 }
  0xe3   :  { %v198_v18 = vpop.f32.mrb[2].mxu0 }
  0xe4   :  { %v204_v19 = vpop.f32.mrb[2].mxu1  ;;  %156 = vst.msk [vmem:[%s310_s2 + $0x18] sm:$0xff] %vm23_vm0, %v198_v18  ;;  %v124_v20 = vpop.f32.mrb[3].mxu0 }
  0xe5   :  { %160 = vst.msk [vmem:[%s310_s2 + $0x38] sm:$0xff] %vm23_vm0, %v204_v19  ;;  %v144_v21 = vpop.f32.mrb[3].mxu1  ;;  %155 = vst.msk [vmem:[%s310_s2 + $0x10] sm:$0xff] %vm23_vm0, %v124_v20 }
  0xe6   :  { %159 = vst.msk [vmem:[%s310_s2 + $0x30] sm:$0xff] %vm23_vm0, %v144_v21 }

</bundles_post_ra>
